<compile_context>
chip_gen: v6e
topology: v6e:2x2x1
jax: 0.10.0
libtpu: 0.0.40
codegen_flags: <defaults>
</compile_context>

<pallas_src>
import jax
import jax.numpy as jnp
from jax.experimental import pallas as pl
from jax.experimental.pallas import tpu as pltpu


def _round_up(x: int, m: int) -> int:
    return ((x + m - 1) // m) * m


def _lowest(dtype):
    """Identity element for max in `dtype` (as a Python scalar)."""
    dtype = jnp.dtype(dtype)
    if jnp.issubdtype(dtype, jnp.floating):
        # 1-byte float formats (fp8, e.g. float8_e4m3fn) have no inf encoding;
        # -inf would become NaN and poison the max.  Use the finite minimum.
        if dtype.itemsize >= 2:
            return float("-inf")
        return float(jnp.finfo(dtype).min)
    if jnp.issubdtype(dtype, jnp.integer):
        return int(jnp.iinfo(dtype).min)
    if dtype == jnp.bool_:
        return False
    raise NotImplementedError(f"Unsupported dtype for max reduction: {dtype}")


def _plan_tiles(B, N, D, itemsize, budget):
    """Pick (TB, TN, TD, grid) with input block <= budget bytes and no HBM padding."""
    sub = max(8, 32 // itemsize)      # sublane multiple for the N block dim
    lane = 128

    # Batch: keep the whole batch resident unless even a minimal
    # (TB, sub, min(D,128)) block would blow the budget.  B is not a
    # layout-constrained dim of the 3-D input block; the 2-D output block needs
    # TB to be a multiple of 8 or equal to B.
    d_min = min(D, lane)
    TB = B
    if B * sub * d_min * itemsize > budget:
        TB = min(B, max(8, (budget // (sub * d_min * itemsize)) // 8 * 8))
    b_blocks = pl.cdiv(B, TB)

    # Hidden dim: prefer the full D (single contiguous HBM run per (b, n) row);
    # tile in 128-lane multiples only when it does not fit.
    if TB * sub * D * itemsize <= budget:
        TD = D
    else:
        TD = max(lane, (budget // (TB * sub * itemsize)) // lane * lane)
        d_req = pl.cdiv(D, TD)
        TD = min(TD, _round_up(pl.cdiv(D, d_req), lane))     # balance blocks
    d_blocks = pl.cdiv(D, TD)

    # v7x megacore: keep the parallel grid extent >= 2 so both TensorCores get
    # work.  No effect on correctness; harmless on single-TC v5e/v6e.
    if b_blocks * d_blocks == 1 and D > lane:
        TD = _round_up(pl.cdiv(D, 2), lane)
        d_blocks = pl.cdiv(D, TD)

    # Reduction axis: spend the remaining budget, balanced across the number of
    # steps actually required.  A single covering block uses the full-dim form
    # (no in-kernel masking needed in that case).
    TN = max(sub, (budget // (TB * TD * itemsize)) // sub * sub)
    TN = min(TN, _round_up(N, sub))
    n_req = pl.cdiv(N, TN)
    TN = min(TN, _round_up(pl.cdiv(N, n_req), sub))
    if TN >= N:
        TN = N
    n_blocks = pl.cdiv(N, TN)

    return TB, TN, TD, (b_blocks, d_blocks, n_blocks)


def _make_kernel(n_total, tn, lowest):
    rem = n_total % tn   # static: #valid rows in the last N block (0 == exact fit)

    def kernel(seq_ref, out_ref):
        # seq_ref: (TB, TN, TD) tile; out_ref: (TB, TD) VMEM-resident accumulator.
        n_idx = pl.program_id(2)

        @pl.when(n_idx == 0)
        def _init():
            out_ref[...] = jnp.full(out_ref.shape, lowest, out_ref.dtype)

        x = seq_ref[...]
        if rem:
            # Ragged last N block: out-of-bounds rows hold unspecified data;
            # force them to the max identity before the reduce.
            last = pl.num_programs(2) - 1
            row = jax.lax.broadcasted_iota(jnp.int32, x.shape, 1)
            x = jnp.where((n_idx < last) | (row < rem), x, lowest)

        out_ref[...] = jnp.maximum(out_ref[...], jnp.max(x, axis=1))

    return kernel


def max_readout(seq: jax.Array, *, block_bytes: int = 16 * 1024 * 1024,
                force_pallas: bool = False) -> jax.Array:
    """Max over axis 1 of a (B, N, D) array == torch.max(seq, 1).values."""
    B, N, D = seq.shape
    dtype = seq.dtype
    itemsize = jnp.dtype(dtype).itemsize

    # Tiny problems: a fused XLA reduce beats the fixed pallas_call/DMA overhead.
    if not force_pallas and seq.size * itemsize < 512 * 1024:
        return jnp.max(seq, axis=1)

    lowest = _lowest(dtype)

    # Clamp the per-step input block so the double-buffered footprint always
    # fits v7x's 64 MiB physical VMEM (2 x 20 MiB + outputs + slack < 48 MiB).
    budget = max(64 * 1024, min(int(block_bytes), 20 * 1024 * 1024))
    TB, TN, TD, grid = _plan_tiles(B, N, D, itemsize, budget)

    in_block = TB * TN * TD * itemsize
    out_block = TB * TD * itemsize
    vmem_limit = int(max(16 * 1024 * 1024,
                         2 * in_block + 2 * out_block + 4 * 1024 * 1024))

    cost = pl.CostEstimate(          # unpadded sizes: kernel reads exactly B*N*D
        flops=B * N * D,
        transcendentals=0,
        bytes_accessed=(B * N * D + B * D) * itemsize,
    )

    return pl.pallas_call(
        _make_kernel(N, TN, lowest),
        out_shape=jax.ShapeDtypeStruct((B, D), dtype),
        grid=grid,
        in_specs=[pl.BlockSpec((TB, TN, TD), lambda b, d, n: (b, n, d))],
        out_specs=pl.BlockSpec((TB, TD), lambda b, d, n: (b, d)),
        compiler_params=pltpu.CompilerParams(
            dimension_semantics=("parallel", "parallel", "arbitrary"),
            vmem_limit_bytes=vmem_limit,
        ),
        cost_estimate=cost,
    )(seq)


if __name__ == "__main__":
    key = jax.random.PRNGKey(0)
    k_small, k_big, k_odd = jax.random.split(key, 3)

    # Small shape consistent with the module: batch=2, nodes(seq)=8, hidden=32.
    seq_small = jax.random.normal(k_small, (2, 8, 32), dtype=jnp.float32)
    out_small = jax.block_until_ready(max_readout(seq_small, force_pallas=True))
    ref_small = jnp.max(seq_small, axis=1)
    assert out_small.shape == ref_small.shape == (2, 32)
    assert jnp.allclose(out_small, ref_small), "Pallas MaxReadout mismatch (small)"

    # Dispatch path for tiny inputs (plain jnp.max) must also match.
    out_small_fast = jax.block_until_ready(max_readout(seq_small))
    assert jnp.allclose(out_small_fast, ref_small)

    # Larger, unaligned shape: full-N single-step reduce, megacore D split,
    # full-batch (B=10) output block via the full-dim exception — no padding.
    seq_big = jax.random.normal(k_big, (10, 1000, 700), dtype=jnp.float32)
    out_big = jax.block_until_ready(max_readout(seq_big))
    ref_big = jnp.max(seq_big, axis=1)
    assert out_big.shape == ref_big.shape == (10, 700)
    assert jnp.allclose(out_big, ref_big), "Pallas MaxReadout mismatch (big)"

    # Force a tiny block budget so the reduction is multi-step with a ragged
    # last N block (in-kernel iota mask) and a partial last D block.
    seq_odd = jax.random.normal(k_odd, (6, 1001, 644), dtype=jnp.float32)
    out_odd = jax.block_until_ready(max_readout(seq_odd, block_bytes=64 * 1024))
    ref_odd = jnp.max(seq_odd, axis=1)
    assert out_odd.shape == ref_odd.shape == (6, 644)
    assert jnp.allclose(out_odd, ref_odd), "Pallas MaxReadout mismatch (ragged)"

    print("KERNEL_OK")
</pallas_src>

<mosaic_0001>
module attributes {stable_mosaic.version = 11 : i64} {
  func.func @kernel(%arg0: i32, %arg1: i32, %arg2: i32, %arg3: memref<2x8x32xf32, #tpu.memory_space<vmem>>, %arg4: memref<2x32xf32, #tpu.memory_space<vmem>>) attributes {dimension_semantics = [#tpu.dimension_semantics<parallel>, #tpu.dimension_semantics<parallel>, #tpu.dimension_semantics<arbitrary>], iteration_bounds = array<i64: 1, 1, 1>, scalar_prefetch = 0 : i64, scratch_operands = 0 : i64, tpu.core_type = #tpu.core_type<tc>, window_params = [{transform_indices = @transform_0, window_bounds = array<i64: 2, 8, 32>}, {transform_indices = @transform_1, window_bounds = array<i64: 2, 32>}]} {
    %c0_i32 = arith.constant 0 : i32
    %0 = arith.cmpi eq, %arg2, %c0_i32 : i32
    %1 = arith.extui %0 : i1 to i32
    %c0_i32_0 = arith.constant 0 : i32
    %2 = arith.cmpi ne, %1, %c0_i32_0 : i32
    scf.if %2 {
      %cst_7 = arith.constant 0xFF800000 : f32
      %8 = vector.broadcast %cst_7 : f32 to vector<2x32xf32>
      %c0_8 = arith.constant 0 : index
      %c0_9 = arith.constant 0 : index
      %9 = vector.load %arg4[%c0_8, %c0_9] : memref<2x32xf32, #tpu.memory_space<vmem>>, vector<2x32xf32>
      tpu.vector_store %arg4[%c0_8, %c0_9], %8 {strides = array<i32>} : memref<2x32xf32, #tpu.memory_space<vmem>>, vector<2x32xf32>,
    } else {
    }
    %c0 = arith.constant 0 : index
    %c0_1 = arith.constant 0 : index
    %c0_2 = arith.constant 0 : index
    %3 = vector.load %arg3[%c0, %c0_1, %c0_2] : memref<2x8x32xf32, #tpu.memory_space<vmem>>, vector<2x8x32xf32>
    %c0_3 = arith.constant 0 : index
    %c0_4 = arith.constant 0 : index
    %4 = vector.load %arg4[%c0_3, %c0_4] : memref<2x32xf32, #tpu.memory_space<vmem>>, vector<2x32xf32>
    %cst = arith.constant dense<0xFF800000> : vector<2x32xf32>
    %5 = vector.multi_reduction <maximumf>, %3, %cst [1] : vector<2x8x32xf32> to vector<2x32xf32>
    %6 = arith.maximumf %4, %5 : vector<2x32xf32>
    %c0_5 = arith.constant 0 : index
    %c0_6 = arith.constant 0 : index
    %7 = vector.load %arg4[%c0_5, %c0_6] : memref<2x32xf32, #tpu.memory_space<vmem>>, vector<2x32xf32>
    tpu.vector_store %arg4[%c0_5, %c0_6], %6 {strides = array<i32>} : memref<2x32xf32, #tpu.memory_space<vmem>>, vector<2x32xf32>,
    return
  }
  func.func @transform_0(%arg0: i32, %arg1: i32, %arg2: i32) -> (i32, i32, i32) {
    %c0_i32 = arith.constant 0 : i32
    return %arg0, %arg2, %arg1 : i32, i32, i32
  }
  func.func @transform_1(%arg0: i32, %arg1: i32, %arg2: i32) -> (i32, i32) {
    %c0_i32 = arith.constant 0 : i32
    return %arg0, %arg1 : i32, i32
  }
}

</mosaic_0001>

<bundles_post_ra>
// kernel: tpu_custom_call.1
= control target key start
LH: loop header
LB: loop body
LE: loop exit
PB: predicated region body
PF: predicated region fallthrough
CT: control target
= control target key end

     0   :  { %6 = vsyncpa [#allocation3], 0  ;;  %s142_s0 = inlined_call_operand.hbm [shape: f32[2,8,32], index: 0, kind: input, shape index: {}]   ;;  %s143_s1 = inlined_call_operand.hbm [shape: f32[2,32], index: 1, kind: output, shape index: {}]  }
   0x1   :  { %7 = vsyncpa [#allocation4], 0  ;;  %s119_s6 = smov [#allocation2]  }
   0x2   :  { %s13_s7 = sshll.u32 %s119_s6, 4  ;;  %s14_s7 = int_to_ptr.vmem [resolvable:$true] %s13_s7 }
   0x3   :  { %s83_s8 = scalar_lea.vmem %s14_s7, 256  ;;  %p88_p1 = scmp.lt.s32.totalorder %s14_s7, %s14_s7 }
   0x4   :  { %p84_p0 = scmp.ne.s32.totalorder %s14_s7, %s83_s8  ;;  %p89_p2 = scmp.lt.s32.totalorder %s83_s8, %s83_s8 }
   0x6   :  { %p90_p3 = por %p89_p2, %p88_p1 }
   0x8   :  { %p91_p4 = pnand %p90_p3, %p84_p0 }
   0xa   :  { %94 = shalt.err (!%p91_p4)
}
   0xb   :  { %s120_s9 = smov 128   ;;  %s121_s10 = smov 8  }
   0xc   :  { %19 = dma.hbm_to_vmem [thread:$0]  %s142_s0, 256, %s14_s7, [#allocation3], %s120_s9, %s120_s9, %s121_s10  }
   0xd   :  { %115 = dma.done.wait [#allocation3], 256  }
   0xe   :  { %116 = vsyncadd [#allocation3], 4294967040  ;;  %vm27_vm0 = vcmask 254976   ;;  %v122_v0 = vmov -inf   ;;  %vm32_vm1 = vcmask 261120   ;;  %v29_v1 = vld [vmem:[#allocation2] sm:$0xff] }
   0xf   :  { %28 = vst.msk [vmem:[#allocation5] sm:$0x3] %vm27_vm0, %v122_v0  ;;  %v30_v2 = vld [vmem:[#allocation2 + $0x8] sm:$0xff]  ;;  %v33_v3 = vsel %vm32_vm1, %v29_v1, -inf  ;;  %vm49_vm2 = vcmask 1041409   ;;  %s123_s0 = smov [#allocation5]  }
  0x10   :  { %v40_v4 = vsel %vm32_vm1, %v30_v2, -inf  ;;  %v34_v5 = vrot.slane %v33_v3, 4  ;;  %s61_s13 = sshll.u32 %s123_s0, 4  ;;  %s62_s13 = int_to_ptr.vmem [resolvable:$true] %s61_s13 }
  0x11   :  { %v41_v6 = vrot.slane %v40_v4, 4  ;;  %s95_s14 = scalar_lea.vmem %s62_s13, 32  ;;  %p100_p6 = scmp.lt.s32.totalorder %s62_s13, %s62_s13 }
  0x12   :  { %v35_v7 = vmax.f32 %v33_v3, %v34_v5  ;;  %p96_p5 = scmp.ne.s32.totalorder %s62_s13, %s95_s14  ;;  %p101_p7 = scmp.lt.s32.totalorder %s95_s14, %s95_s14 }
  0x13   :  { %v42_v8 = vmax.f32 %v40_v4, %v41_v6 }
  0x14   :  { %v36_v9 = vrot.slane %v35_v7, 2  ;;  %p102_p8 = por %p101_p7, %p100_p6 }
  0x15   :  { %v43_v10 = vrot.slane %v42_v8, 2 }
  0x16   :  { %v37_v11 = vmax.f32 %v35_v7, %v36_v9  ;;  %v31_v15 = vld [vmem:[#allocation5] sm:$0x3]  ;;  %p103_p9 = pnand %p102_p8, %p96_p5 }
  0x17   :  { %v44_v12 = vmax.f32 %v42_v8, %v43_v10 }
  0x18   :  { %v38_v13 = vrot.slane %v37_v11, 1 }
  0x19   :  { %v45_v14 = vrot.slane %v44_v12, 1 }
  0x1a   :  { %v39_v16 = vmax.f32 %v37_v11, %v38_v13 }
  0x1b   :  { %v46_v17 = vmax.f32 %v44_v12, %v45_v14 }
  0x1d   :  { %v50_v18 = vsel %vm49_vm2, %v46_v17, %v39_v16 }
  0x1e   :  { %v52_v19 = vmax.f32 %v31_v15, %v50_v18 }
  0x20   :  { %54 = vst.msk [vmem:[#allocation5] sm:$0x3] %vm27_vm0, %v52_v19 }
  0x21   :  { %106 = shalt.err (!%p103_p9)
}
  0x22   :  { %64 = dma.vmem_to_hbm [thread:$0]  %s62_s13, 32, %s143_s1, [#allocation4]  }
  0x23   :  { %117 = dma.done.wait [#allocation4], 32  }
  0x24   :  { %118 = vsyncadd [#allocation4], 4294967264 }
  0x25   :  { %68 = vsyncpa [#allocation3], 1 }
  0x26   :  { %69 = vsyncpa [#allocation4], 1 }

</bundles_post_ra>
